<compile_context>
chip_gen: v5e
topology: v5e:2x2
jax: 0.10.0
libtpu: 0.0.40
codegen_flags: <defaults>
</compile_context>

<pallas_src>
import functools
import math

import jax
import jax.numpy as jnp
from jax.experimental import pallas as pl
from jax.experimental.pallas import tpu as pltpu


# ------------------------------- the kernel ---------------------------------

def _conv_kernel(x_ref, w_ref, b_ref, o_ref, *, seq_len, shifts, compute_dtype):
    m, _ = x_ref.shape
    hout = o_ref.shape[-1]

    x = x_ref[...]                                        # [Rt, Cin], input dtype
    # position of each row inside its own sequence (for padding-boundary mask)
    t = jax.lax.broadcasted_iota(jnp.int32, (m, 1), 0) % seq_len

    acc = jnp.zeros((m, hout), jnp.float32)
    for j, n in enumerate(shifts):                        # static unroll over taps
        if n == 0:
            xs = x
        else:
            sh = n % m                                    # non-negative rotate amount
            xs = pltpu.roll(x, shift=sh, axis=0) if sh else x
            # rows whose source index t-n falls outside [0, S-1] read zero padding;
            # this also kills rows that rolled across sequence/block boundaries.
            valid = (t >= n) & (t <= seq_len - 1 + n)
            xs = jnp.where(valid, xs, 0)
        acc = acc + jnp.dot(xs.astype(compute_dtype), w_ref[j],
                            preferred_element_type=jnp.float32)

    acc = acc + b_ref[...]                                # [1, Cout] broadcast
    o_ref[...] = acc.astype(o_ref.dtype)


# -------------------------------- wrapper ------------------------------------

def _pick_block_rows(total_rows, seq_len, bytes_per_row, *,
                     target_rows=2048, min_grid_steps=1,
                     vmem_budget_bytes=24 * 1024 * 1024):
    """Largest row tile that (a) is a multiple of S (mask validity) and of 8
    (sublane-aligned BlockSpec), (b) divides total_rows, (c) fits the VMEM
    budget and (d) keeps >= min_grid_steps grid steps. Falls back to a single
    full-size block (always a legal BlockSpec: equals the full array dim)."""
    step = seq_len * 8 // math.gcd(seq_len, 8)            # lcm(S, 8)
    cap = min(target_rows,
              max(step, vmem_budget_bytes // max(bytes_per_row, 1)),
              max(1, total_rows // max(min_grid_steps, 1)))
    best = None
    rt = step
    while rt <= cap:
        if total_rows % rt == 0:
            best = rt
        rt += step
    return best if best is not None else total_rows


def conv_seq(x, weight, bias, *, pad_type, block_rows=None,
             compute_dtype=jnp.bfloat16, out_dtype=jnp.float32,
             min_grid_steps=1):
    """Pallas equivalent of Conv.forward for x of shape [B, S, Cin].

    weight: torch Conv1d layout [Cout, Cin, K]; bias: [Cout].
    Set min_grid_steps=2 when targeting v7x (2 TensorCores); out_dtype=bfloat16
    halves output HBM bytes if the consumer accepts bf16.
    """
    B, S, Cin = x.shape
    Cout, Cin_w, K = weight.shape
    assert Cin_w == Cin

    left = K - 1 if pad_type == "left" else K // 2
    shifts = tuple(left - j for j in range(K))            # row shift per tap

    # [B, S, Cin] -> [B*S, Cin] is a free row-major view; no channel padding.
    M = B * S
    xf = x.reshape(M, Cin)
    wt = jnp.transpose(weight, (2, 1, 0)).astype(compute_dtype)   # [K, Cin, Cout]
    bf = bias.reshape(1, Cout).astype(jnp.float32)

    x_bytes = jnp.dtype(x.dtype).itemsize
    out_bytes = jnp.dtype(out_dtype).itemsize
    bytes_per_row = (2 * Cin * x_bytes       # double-buffered input block
                     + 2 * Cout * out_bytes  # double-buffered output block
                     + 4 * Cout              # f32 accumulator
                     + 8 * Cin)              # rolled/masked tap temporaries
    rt = block_rows if block_rows is not None else _pick_block_rows(
        M, S, bytes_per_row, min_grid_steps=min_grid_steps)
    assert M % rt == 0 and rt % S == 0, "row tile must tile B*S and be a multiple of S"
    grid = (M // rt,)

    kernel = functools.partial(_conv_kernel, seq_len=S, shifts=shifts,
                               compute_dtype=compute_dtype)

    y = pl.pallas_call(
        kernel,
        out_shape=jax.ShapeDtypeStruct((M, Cout), out_dtype),
        grid=grid,
        in_specs=[
            pl.BlockSpec((rt, Cin), lambda i: (i, 0)),
            pl.BlockSpec((K, Cin, Cout), lambda i: (0, 0, 0)),
            pl.BlockSpec((1, Cout), lambda i: (0, 0)),
        ],
        out_specs=pl.BlockSpec((rt, Cout), lambda i: (i, 0)),
        compiler_params=pltpu.CompilerParams(dimension_semantics=("parallel",)),
    )(xf, wt, bf)

    return y.reshape(B, S, Cout)


# --------------------------- pure-JAX reference -------------------------------

def reference_conv(x, weight, bias, pad_type):
    Cout, Cin, K = weight.shape
    if pad_type == "left":
        left, right = K - 1, 0
    else:
        left, right = K // 2, (K - 1) // 2
    xp = jnp.pad(x, ((0, 0), (left, right), (0, 0)))
    S = x.shape[1]
    y = jnp.zeros(x.shape[:2] + (Cout,), jnp.float32)
    for j in range(K):
        y = y + jnp.einsum("bsc,oc->bso", xp[:, j:j + S, :], weight[:, :, j],
                           precision=jax.lax.Precision.HIGHEST)
    return y + bias


# ---------------------------------- main --------------------------------------

if __name__ == "__main__":
    key = jax.random.PRNGKey(0)
    k1, k2, k3, k4, k5 = jax.random.split(key, 5)

    # Case 1: Conv(input_size=32, output_size=64, kernel_size=3, pad_type='left')
    # with bf16 MXU operands (f32 accumulation).
    B, S, Cin, Cout, K = 4, 8, 32, 64, 3
    x = jax.random.normal(k1, (B, S, Cin), dtype=jnp.float32)
    w = (0.1 * jax.random.normal(k2, (Cout, Cin, K))).astype(jnp.float32)
    b = (0.1 * jax.random.normal(k3, (Cout,))).astype(jnp.float32)

    y = jax.block_until_ready(
        conv_seq(x, w, b, pad_type="left", compute_dtype=jnp.bfloat16))
    y_ref = reference_conv(x, w, b, "left")
    err = float(jnp.max(jnp.abs(y - y_ref)))
    assert y.shape == y_ref.shape
    assert jnp.allclose(y, y_ref, atol=3e-2, rtol=3e-2), err

    # Case 2: Conv(32, 32, kernel_size=5, pad_type='both'), f32 compute path
    # (tight tolerance; also exercises negative tap shifts).
    K2, Cout2 = 5, 32
    w2 = (0.1 * jax.random.normal(k4, (Cout2, Cin, K2))).astype(jnp.float32)
    b2 = (0.1 * jax.random.normal(k5, (Cout2,))).astype(jnp.float32)

    y2 = jax.block_until_ready(
        conv_seq(x, w2, b2, pad_type="both", compute_dtype=jnp.float32))
    y2_ref = reference_conv(x, w2, b2, "both")
    err2 = float(jnp.max(jnp.abs(y2 - y2_ref)))
    assert y2.shape == y2_ref.shape
    assert jnp.allclose(y2, y2_ref, atol=2e-4, rtol=2e-4), err2

    print("KERNEL_OK")
</pallas_src>

<mosaic_0001>
module attributes {stable_mosaic.version = 11 : i64} {
  func.func @_conv_kernel(%arg0: i32, %arg1: memref<32x32xf32, #tpu.memory_space<vmem>>, %arg2: memref<3x32x64xbf16, #tpu.memory_space<vmem>>, %arg3: memref<1x64xf32, #tpu.memory_space<vmem>>, %arg4: memref<32x64xf32, #tpu.memory_space<vmem>>) attributes {dimension_semantics = [#tpu.dimension_semantics<parallel>], iteration_bounds = array<i64: 1>, scalar_prefetch = 0 : i64, scratch_operands = 0 : i64, tpu.core_type = #tpu.core_type<tc>, window_params = [{transform_indices = @transform_0, window_bounds = array<i64: 32, 32>}, {pipeline_mode = #tpu.pipeline_mode<synchronous>, transform_indices = @transform_1, window_bounds = array<i64: 3, 32, 64>}, {pipeline_mode = #tpu.pipeline_mode<synchronous>, transform_indices = @transform_2, window_bounds = array<i64: 1, 64>}, {transform_indices = @transform_3, window_bounds = array<i64: 32, 64>}]} {
    %c0 = arith.constant 0 : index
    %c0_0 = arith.constant 0 : index
    %0 = vector.load %arg1[%c0, %c0_0] : memref<32x32xf32, #tpu.memory_space<vmem>>, vector<32x32xf32>
    %1 = tpu.iota {dimensions = array<i32: 0>} : vector<32x1xi32>
    %c8_i32 = arith.constant 8 : i32
    %c0_i32 = arith.constant 0 : i32
    %2 = arith.cmpi eq, %c8_i32, %c0_i32 : i32
    %c1_i32 = arith.constant 1 : i32
    %3 = arith.select %2, %c1_i32, %c8_i32 : i32
    %4 = vector.broadcast %3 : i32 to vector<32x1xi32>
    %5 = arith.remsi %1, %4 : vector<32x1xi32>
    %c0_i32_1 = arith.constant 0 : i32
    %6 = vector.broadcast %c0_i32_1 : i32 to vector<32x1xi32>
    %7 = arith.cmpi ne, %5, %6 : vector<32x1xi32>
    %c0_i32_2 = arith.constant 0 : i32
    %8 = vector.broadcast %c0_i32_2 : i32 to vector<32x1xi32>
    %9 = arith.cmpi slt, %5, %8 : vector<32x1xi32>
    %c0_i32_3 = arith.constant 0 : i32
    %10 = arith.cmpi slt, %3, %c0_i32_3 : i32
    %11 = vector.broadcast %10 : i1 to vector<32x1xi1>
    %12 = vector.broadcast %11 : vector<32x1xi1> to vector<32x1xi1>
    %13 = arith.xori %9, %12 : vector<32x1xi1>
    %14 = arith.andi %13, %7 : vector<32x1xi1>
    %15 = vector.broadcast %3 : i32 to vector<32x1xi32>
    %16 = arith.addi %5, %15 : vector<32x1xi32>
    %17 = arith.select %14, %16, %5 : vector<32x1xi1>, vector<32x1xi32>
    %cst = arith.constant 0.000000e+00 : f32
    %18 = vector.broadcast %cst : f32 to vector<32x64xf32>
    %c2_i32 = arith.constant 2 : i32
    %19 = tpu.dynamic_rotate %0 by %c2_i32 dim 0 : vector<32x32xf32>, i32 -> vector<32x32xf32>
    %c2_i32_4 = arith.constant 2 : i32
    %20 = vector.broadcast %c2_i32_4 : i32 to vector<32x1xi32>
    %21 = arith.cmpi sge, %17, %20 : vector<32x1xi32>
    %c9_i32 = arith.constant 9 : i32
    %22 = vector.broadcast %c9_i32 : i32 to vector<32x1xi32>
    %23 = arith.cmpi sle, %17, %22 : vector<32x1xi32>
    %24 = arith.andi %21, %23 : vector<32x1xi1>
    %c0_i32_5 = arith.constant 0 : i32
    %25 = arith.sitofp %c0_i32_5 : i32 to f32
    %26 = vector.shape_cast %24 : vector<32x1xi1> to vector<32x1xi1>
    %27 = vector.broadcast %26 : vector<32x1xi1> to vector<32x32xi1>
    %28 = vector.broadcast %25 : f32 to vector<32x32xf32>
    %29 = arith.select %27, %19, %28 : vector<32x32xi1>, vector<32x32xf32>
    %30 = arith.truncf %29 : vector<32x32xf32> to vector<32x32xbf16>
    %c0_6 = arith.constant 0 : index
    %c0_7 = arith.constant 0 : index
    %c0_8 = arith.constant 0 : index
    %31 = vector.load %arg2[%c0_6, %c0_7, %c0_8] : memref<3x32x64xbf16, #tpu.memory_space<vmem>>, vector<1x32x64xbf16>
    %32 = vector.shape_cast %31 : vector<1x32x64xbf16> to vector<32x64xbf16>
    %cst_9 = arith.constant dense<0.000000e+00> : vector<32x64xf32>
    %33 = tpu.matmul %30, %32, %cst_9 {dimension_numbers = #tpu.dot_dimension_numbers<[1], [0], [0], [1], [0, 0, 1, 1], [], []>} : vector<32x32xbf16>, vector<32x64xbf16>, vector<32x64xf32> -> vector<32x64xf32>
    %34 = arith.addf %18, %33 : vector<32x64xf32>
    %c1_i32_10 = arith.constant 1 : i32
    %35 = tpu.dynamic_rotate %0 by %c1_i32_10 dim 0 : vector<32x32xf32>, i32 -> vector<32x32xf32>
    %c1_i32_11 = arith.constant 1 : i32
    %36 = vector.broadcast %c1_i32_11 : i32 to vector<32x1xi32>
    %37 = arith.cmpi sge, %17, %36 : vector<32x1xi32>
    %c8_i32_12 = arith.constant 8 : i32
    %38 = vector.broadcast %c8_i32_12 : i32 to vector<32x1xi32>
    %39 = arith.cmpi sle, %17, %38 : vector<32x1xi32>
    %40 = arith.andi %37, %39 : vector<32x1xi1>
    %c0_i32_13 = arith.constant 0 : i32
    %41 = arith.sitofp %c0_i32_13 : i32 to f32
    %42 = vector.shape_cast %40 : vector<32x1xi1> to vector<32x1xi1>
    %43 = vector.broadcast %42 : vector<32x1xi1> to vector<32x32xi1>
    %44 = vector.broadcast %41 : f32 to vector<32x32xf32>
    %45 = arith.select %43, %35, %44 : vector<32x32xi1>, vector<32x32xf32>
    %46 = arith.truncf %45 : vector<32x32xf32> to vector<32x32xbf16>
    %c1 = arith.constant 1 : index
    %c0_14 = arith.constant 0 : index
    %c0_15 = arith.constant 0 : index
    %47 = vector.load %arg2[%c1, %c0_14, %c0_15] : memref<3x32x64xbf16, #tpu.memory_space<vmem>>, vector<1x32x64xbf16>
    %48 = vector.shape_cast %47 : vector<1x32x64xbf16> to vector<32x64xbf16>
    %cst_16 = arith.constant dense<0.000000e+00> : vector<32x64xf32>
    %49 = tpu.matmul %46, %48, %cst_16 {dimension_numbers = #tpu.dot_dimension_numbers<[1], [0], [0], [1], [0, 0, 1, 1], [], []>} : vector<32x32xbf16>, vector<32x64xbf16>, vector<32x64xf32> -> vector<32x64xf32>
    %50 = arith.addf %34, %49 : vector<32x64xf32>
    %51 = arith.truncf %0 : vector<32x32xf32> to vector<32x32xbf16>
    %c2 = arith.constant 2 : index
    %c0_17 = arith.constant 0 : index
    %c0_18 = arith.constant 0 : index
    %52 = vector.load %arg2[%c2, %c0_17, %c0_18] : memref<3x32x64xbf16, #tpu.memory_space<vmem>>, vector<1x32x64xbf16>
    %53 = vector.shape_cast %52 : vector<1x32x64xbf16> to vector<32x64xbf16>
    %cst_19 = arith.constant dense<0.000000e+00> : vector<32x64xf32>
    %54 = tpu.matmul %51, %53, %cst_19 {dimension_numbers = #tpu.dot_dimension_numbers<[1], [0], [0], [1], [0, 0, 1, 1], [], []>} : vector<32x32xbf16>, vector<32x64xbf16>, vector<32x64xf32> -> vector<32x64xf32>
    %55 = arith.addf %50, %54 : vector<32x64xf32>
    %c0_20 = arith.constant 0 : index
    %c0_21 = arith.constant 0 : index
    %56 = vector.load %arg3[%c0_20, %c0_21] : memref<1x64xf32, #tpu.memory_space<vmem>>, vector<1x64xf32>
    %57 = vector.broadcast %56 : vector<1x64xf32> to vector<32x64xf32>
    %58 = arith.addf %55, %57 : vector<32x64xf32>
    %c0_22 = arith.constant 0 : index
    %c0_23 = arith.constant 0 : index
    %59 = vector.load %arg4[%c0_22, %c0_23] : memref<32x64xf32, #tpu.memory_space<vmem>>, vector<32x64xf32>
    tpu.vector_store %arg4[%c0_22, %c0_23], %58 {strides = array<i32>} : memref<32x64xf32, #tpu.memory_space<vmem>>, vector<32x64xf32>,
    return
  }
  func.func @transform_0(%arg0: i32) -> (i32, i32) {
    %c0_i32 = arith.constant 0 : i32
    %c0_i32_0 = arith.constant 0 : i32
    return %arg0, %c0_i32 : i32, i32
  }
  func.func @transform_1(%arg0: i32) -> (i32, i32, i32) {
    %c0_i32 = arith.constant 0 : i32
    %c0_i32_0 = arith.constant 0 : i32
    %c0_i32_1 = arith.constant 0 : i32
    %c0_i32_2 = arith.constant 0 : i32
    return %c0_i32, %c0_i32_0, %c0_i32_1 : i32, i32, i32
  }
  func.func @transform_2(%arg0: i32) -> (i32, i32) {
    %c0_i32 = arith.constant 0 : i32
    %c0_i32_0 = arith.constant 0 : i32
    %c0_i32_1 = arith.constant 0 : i32
    return %c0_i32, %c0_i32_0 : i32, i32
  }
  func.func @transform_3(%arg0: i32) -> (i32, i32) {
    %c0_i32 = arith.constant 0 : i32
    %c0_i32_0 = arith.constant 0 : i32
    return %arg0, %c0_i32 : i32, i32
  }
}

</mosaic_0001>

<bundles_post_ra>
// kernel: tpu_custom_call.1
= control target key start
LH: loop header
LB: loop body
LE: loop exit
PB: predicated region body
PF: predicated region fallthrough
CT: control target
= control target key end

     0   :  { %8 = vsyncpa [#allocation3], 0  ;;  %s582_s0 = inlined_call_operand.hbm [shape: f32[32,32], index: 0, kind: input, shape index: {}]   ;;  %s583_s1 = inlined_call_operand.hbm [shape: bf16[3,32,64], index: 1, kind: input, shape index: {}]   ;;  %s584_s2 = inlined_call_operand.vmem [shape: f32[1,64], index: 2, kind: input, shape index: {}]   ;;  %s585_s3 = inlined_call_operand.hbm [shape: f32[32,64], index: 3, kind: output, shape index: {}]  }
   0x1   :  { %9 = vsyncpa [#allocation6], 0 }
   0x2   :  { %10 = vsyncpa [#allocation4], 0  ;;  %s15_s14 = sshll.u32 %s582_s0, 4  ;;  %s464_s15 = smov [#allocation2]   ;;  %s16_s14 = int_to_ptr.hbm [resolvable:$true] %s15_s14 }
   0x3   :  { %s17_s16 = sshll.u32 %s464_s15, 4  ;;  %s28_s19 = sshll.u32 %s583_s1, 4  ;;  %s18_s16 = int_to_ptr.vmem [resolvable:$true] %s17_s16  ;;  %s29_s19 = int_to_ptr.hbm [resolvable:$true] %s28_s19 }
   0x4   :  { %s465_s20 = smov 128   ;;  %s466_s21 = smov 8  }
   0x5   :  { %23 = dma.hbm_to_vmem [thread:$0]  %s16_s14, 512, %s18_s16, [#allocation3], %s465_s20, %s465_s20, %s466_s21  }
   0x6   :  { %s467_s22 = smov [#allocation5]   ;;  %s468_s24 = smov 64  }
   0x7   :  { %s30_s23 = sshll.u32 %s467_s22, 4  ;;  %s469_s0 = smov 4   ;;  %s31_s23 = int_to_ptr.vmem [resolvable:$true] %s30_s23 }
   0x8   :  { %36 = dma.hbm_to_vmem [thread:$0]  %s29_s19, 768, %s31_s23, [#allocation6], %s468_s24, %s468_s24, %s469_s0  }
   0x9   :  { %458 = dma.done.wait [#allocation3], 512  }
   0xa   :  { %459 = vsyncadd [#allocation3], 4294966784 }
   0xb   :  { %460 = dma.done.wait [#allocation6], 768  }
   0xc   :  { %461 = vsyncadd [#allocation6], 4294966528  ;;  %v52_v0 = vlaneseq  ;;  %v373_v7 = vld [vmem:[#allocation5 + $0x18] sm:$0xff]  ;;  %v371_v8 = vld [vmem:[#allocation5 + $0x8] sm:$0xff]  ;;  %vm196_vm0 = vcmask 261120   ;;  %vm315_vm11 = vcmask 523264  }
   0xd   :  { %v375_v9 = vld [vmem:[#allocation5 + $0x28] sm:$0xff]  ;;  %v372_v11 = vld [vmem:[#allocation5 + $0x10] sm:$0xff]  ;;  %v370_v12 = vld [vmem:[#allocation5] sm:$0xff]  ;;  %209 = vmatpush.bf16.msra.mxu0 %v373_v7  ;;  %246 = vmatpush.bf16.msra.mxu1 %v371_v8  ;;  %s326_s29 = sshll.u32 %s585_s3, 4  ;;  %s327_s29 = int_to_ptr.hbm [resolvable:$true] %s326_s29 }
   0xe   :  { %v500_v1 = vshrl.u32 %v52_v0, 7  ;;  %v48_v15 = vld [vmem:[#allocation2] sm:$0xff]  ;;  %v49_v16 = vld [vmem:[#allocation2 + $0x8] sm:$0xff]  ;;  %v51_v17 = vld [vmem:[#allocation2 + $0x18] sm:$0xff]  ;;  %290 = vmatpush.bf16.msra.mxu2 %v375_v9  ;;  %376 = vmatpush.bf16.msra.mxu3 %v373_v7 }
   0xf   :  { %v374_v21 = vld [vmem:[#allocation5 + $0x20] sm:$0xff]  ;;  %v144_v22 = vrot.slane %v48_v15, 7  ;;  %v145_v23 = vrot.slane %v49_v16, 7  ;;  %v147_v24 = vrot.slane %v51_v17, 7  ;;  %v105_v25 = vrot.slane %v48_v15, 6  ;;  %v50_v26 = vld [vmem:[#allocation2 + $0x10] sm:$0xff] }
  0x10   :  { %v54_v2 = vadd.s32 8, %v500_v1  ;;  %v61_v3 = vand.u32 7, %v500_v1  ;;  %v505_v4 = vadd.s32 16, %v500_v1  ;;  %v56_v5 = vadd.s32 24, %v500_v1  ;;  %v385_v58 = vld [vmem:[%s584_s2] ss:$0 sm:$0xff] }
  0x11   :  { %vm148_vm1 = vcmp.lt.s32.totalorder %v500_v1, 1  ;;  %vm109_vm3 = vcmp.lt.s32.totalorder %v500_v1, 2  ;;  %v106_v27 = vrot.slane %v49_v16, 6  ;;  %v108_v28 = vrot.slane %v51_v17, 6  ;;  %210 = vmatpush.bf16.msra.mxu0 %v372_v11  ;;  %247 = vmatpush.bf16.msra.mxu1 %v370_v12  ;;  %s470_s2 = smov [#allocation7]  }
  0x12   :  { %v68_v6 = vand.u32 7, %v54_v2  ;;  %v75_v10 = vand.u32 7, %v505_v4  ;;  %vm510_vm2 = vcmp.ge.s32.totalorder %v61_v3, 1  ;;  %v82_v14 = vand.u32 7, %v56_v5  ;;  %291 = vmatpush.bf16.msra.mxu2 %v374_v21  ;;  %377 = vmatpush.bf16.msra.mxu3 %v372_v11  ;;  %s324_s26 = sshll.u32 %s470_s2, 4  ;;  %s325_s26 = int_to_ptr.vmem [resolvable:$true] %s324_s26 }
  0x13   :  { %vm519_vm5 = vcmp.ge.s32.totalorder %v61_v3, 2  ;;  %v146_v29 = vrot.slane %v50_v26, 7  ;;  %v151_v31 = vsel %vm148_vm1, %v144_v22, %v145_v23  ;;  %v152_v32 = vsel %vm148_vm1, %v147_v24, %v144_v22 }
  0x14   :  { %vm515_vm4 = vcmp.ge.s32.totalorder %v68_v6, 1  ;;  %vm523_vm6 = vcmp.ge.s32.totalorder %v68_v6, 2  ;;  %vm527_vm7 = vcmp.ge.s32.totalorder %v75_v10, 1  ;;  %v259_v33 = vpack.c.bf16 %v49_v16, %v48_v15 }
  0x15   :  { %vm535_vm8 = vcmp.ge.s32.totalorder %v82_v14, 1  ;;  %v173_v35 = vsel %vm510_vm2, %v152_v32, 0.0  ;;  %v174_v36 = vsel %vm515_vm4, %v151_v31, 0.0  ;;  %v112_v37 = vsel %vm109_vm3, %v105_v25, %v106_v27 }
  0x16   :  { %v113_v38 = vsel %vm109_vm3, %v108_v28, %v105_v25  ;;  %v177_v39 = vpack.c.bf16 %v174_v36, %v173_v35  ;;  %v135_v41 = vsel %vm523_vm6, %v112_v37, 0.0  ;;  %v149_v42 = vsel %vm148_vm1, %v146_v29, %v147_v24  ;;  %368 = vmatmul.msk.bf16.vlgmr.msra.gmra.mxu2 %vm196_vm0, %v259_v33 }
  0x17   :  { %v134_v40 = vsel %vm519_vm5, %v113_v38, 0.0  ;;  %v150_v44 = vsel %vm148_vm1, %v145_v23, %v146_v29  ;;  %v176_v45 = vsel %vm535_vm8, %v149_v42, 0.0  ;;  %v107_v48 = vrot.slane %v50_v26, 6 }
  0x18   :  { %v138_v43 = vpack.c.bf16 %v135_v41, %v134_v40  ;;  %348 = vmatmul.msk.bf16.vlgmr.msra.gmra.mxu0 %vm196_vm0, %v177_v39  ;;  %v175_v46 = vsel %vm527_vm7, %v150_v44, 0.0  ;;  %vm116_vm9 = vcmp.ge.s32.totalorder %v75_v10, 2  ;;  %vm117_vm10 = vcmp.ge.s32.totalorder %v82_v14, 2 }
  0x19   :  { %v178_v47 = vpack.c.bf16 %v176_v45, %v175_v46  ;;  %v110_v49 = vsel %vm109_vm3, %v107_v48, %v108_v28  ;;  %v111_v50 = vsel %vm109_vm3, %v106_v27, %v107_v48  ;;  %v260_v54 = vpack.c.bf16 %v51_v17, %v50_v26 }
  0x1a   :  { %358 = vmatmul.msk.bf16.vlgmr.msra.gmra.mxu1 %vm196_vm0, %v138_v43  ;;  %v136_v51 = vsel %vm116_vm9, %v111_v50, 0.0  ;;  %v137_v52 = vsel %vm117_vm10, %v110_v49, 0.0 }
  0x1b   :  { %349 = vmatmul.msk.bf16.vlgmr.msra.gmra.mxu3 %vm196_vm0, %v178_v47  ;;  %v139_v53 = vpack.c.bf16 %v137_v52, %v136_v51 }
  0x26   :  { %369 = vmatmul.msk.bf16.gmra.mxu2 %vm196_vm0, %v260_v54 }
  0x2a   :  { %359 = vmatmul.msk.bf16.gmra.mxu1 %vm196_vm0, %v139_v53 }
  0x95   :  { %v212_v55 = vpop.f32.mrf.mxu0 }
  0x97   :  { %v249_v56 = vpop.f32.mrf.mxu1 }
  0x98   :  { %v250_v57 = vadd.f32 %v249_v56, %v212_v55 }
  0x99   :  { %v293_v59 = vpop.f32.mrf.mxu2 }
  0x9a   :  { %v303_v60 = vadd.f32 %v293_v59, %v250_v57 }
  0x9c   :  { %v311_v62 = vadd.f32 %v385_v58, %v303_v60 }
  0x9d   :  { %v214_v63 = vpop.f32.mrf.mxu0 }
  0x9e   :  { %316 = vst.msk [vmem:[#allocation7] sm:$0xff] %vm315_vm11, %v311_v62  ;;  %v217_v5 = vpop.f32.mrf.mxu3 }
  0x9f   :  { %v251_v61 = vpop.f32.mrf.mxu1 }
  0xa0   :  { %v252_v0 = vadd.f32 %v251_v61, %v214_v63 }
  0xa1   :  { %v295_v1 = vpop.f32.mrf.mxu2 }
  0xa2   :  { %v304_v2 = vadd.f32 %v295_v1, %v252_v0 }
  0xa4   :  { %v312_v4 = vadd.f32 %v385_v58, %v304_v2 }
  0xa6   :  { %317 = vst.msk [vmem:[#allocation7 + $0x8] sm:$0xff] %vm315_vm11, %v312_v4  ;;  %v219_v11 = vpop.f32.mrf.mxu3 }
  0xa7   :  { %v254_v3 = vpop.f32.mrf.mxu1 }
  0xa8   :  { %v255_v6 = vadd.f32 %v254_v3, %v217_v5 }
  0xa9   :  { %v298_v7 = vpop.f32.mrf.mxu2 }
  0xaa   :  { %v305_v8 = vadd.f32 %v298_v7, %v255_v6 }
  0xac   :  { %v313_v9 = vadd.f32 %v385_v58, %v305_v8 }
  0xae   :  { %318 = vst.msk [vmem:[#allocation7 + $0x10] sm:$0xff] %vm315_vm11, %v313_v9 }
  0xaf   :  { %v256_v10 = vpop.f32.mrf.mxu1 }
  0xb0   :  { %v257_v12 = vadd.f32 %v256_v10, %v219_v11 }
  0xb1   :  { %v300_v13 = vpop.f32.mrf.mxu2 }
  0xb2   :  { %v306_v14 = vadd.f32 %v300_v13, %v257_v12 }
  0xb4   :  { %v314_v15 = vadd.f32 %v385_v58, %v306_v14 }
  0xb6   :  { %319 = vst.msk [vmem:[#allocation7 + $0x18] sm:$0xff] %vm315_vm11, %v314_v15 }
  0xb7   :  { %332 = dma.vmem_to_hbm [thread:$0]  %s325_s26, 512, %s327_s29, [#allocation4], %s465_s20, %s465_s20, %s466_s21  }
  0xb8   :  { %462 = dma.done.wait [#allocation4], 512  }
  0xb9   :  { %463 = vsyncadd [#allocation4], 4294966784 }
  0xba   :  { %337 = vsyncpa [#allocation3], 1 }
  0xbb   :  { %338 = vsyncpa [#allocation6], 1 }
  0xbc   :  { %339 = vsyncpa [#allocation4], 1 }

</bundles_post_ra>
